<compile_context>
chip_gen: v6e
topology: v6e:2x2x1
jax: 0.10.0
libtpu: 0.0.40
codegen_flags: <defaults>
</compile_context>

<pallas_src>
import functools

import jax
import jax.numpy as jnp
from jax import lax
from jax.experimental import pallas as pl
from jax.experimental.pallas import tpu as pltpu


def rbm_kernel(v_ref, wt_ref, w_ref, vb_ref, hb_ref, uh_ref, uv_ref, v_out_ref, *, k):
    """One batch-tile of the RBM CD-k Gibbs chain.

    v_ref    : (TB, n_vis)       f32   visible input tile
    wt_ref   : (n_vis, n_hid)    bf16  W.T (resident across grid)
    w_ref    : (n_hid, n_vis)    bf16  W   (resident across grid)
    vb_ref   : (1, n_vis)        f32
    hb_ref   : (1, n_hid)        f32
    uh_ref   : (k+1, TB, n_hid)  f32   uniforms for hidden-unit sampling
    uv_ref   : (k,   TB, n_vis)  f32   uniforms for visible-unit sampling
    v_out_ref: (TB, n_vis)       f32   last visible sample
    """
    tb, n_vis = v_ref.shape
    n_hid = w_ref.shape[0]

    wt = wt_ref[...]
    w = w_ref[...]
    # Hoist bias broadcasts out of the Gibbs loop (JAX does not CSE broadcast_in_dim).
    hb = jnp.broadcast_to(hb_ref[...], (tb, n_hid))
    vb = jnp.broadcast_to(vb_ref[...], (tb, n_vis))

    def sigmoid(x):
        # Single-EUP form: sigmoid(x) = 0.5 * (tanh(x/2) + 1); elementwise math stays f32.
        return 0.5 * (jnp.tanh(0.5 * x) + 1.0)

    def vis_hid_sample(v_bf16, u):
        # F.linear(v, W, h_bias) = v @ W.T + h_bias   (MXU bf16, f32 accumulate)
        pre = jnp.dot(v_bf16, wt, preferred_element_type=jnp.float32) + hb
        p_h = sigmoid(pre)
        # relu(sign(p - u)) == 1 where p > u else 0 (tie -> 0, matches torch)
        return (p_h > u).astype(jnp.bfloat16)

    def hid_vis_sample(h_bf16, u):
        # F.linear(h, W.t(), v_bias) = h @ W + v_bias
        pre = jnp.dot(h_bf16, w, preferred_element_type=jnp.float32) + vb
        p_v = sigmoid(pre)
        return (p_v > u).astype(jnp.bfloat16)

    h = vis_hid_sample(v_ref[...].astype(jnp.bfloat16), uh_ref[0])

    if k <= 4:
        # Small compile-time k: unrolled Gibbs chain (LLO scheduler visibility).
        v_s = None
        for step in range(k):
            v_s = hid_vis_sample(h, uv_ref[step])
            h = vis_hid_sample(v_s, uh_ref[step + 1])
    else:
        # Large k: rolled loop keeps vreg live ranges / code size bounded.
        def body(i, carry):
            h_c, _ = carry
            v_c = hid_vis_sample(h_c, uv_ref[i])
            h_n = vis_hid_sample(v_c, uh_ref[i + 1])
            return (h_n, v_c)

        h, v_s = lax.fori_loop(0, k, body,
                               (h, jnp.zeros((tb, n_vis), jnp.bfloat16)))

    # Samples are exactly {0, 1}; cast back to f32 for the output.
    v_out_ref[...] = v_s.astype(jnp.float32)


def _pick_batch_tile(batch):
    for tb in (256, 128, 64, 32, 16, 8):
        if batch % tb == 0:
            return tb
    return batch


def rbm_forward(v, W, v_bias, h_bias, k, key):
    """Returns (v, v_) exactly like RBM.forward. Requires k >= 1 (as the torch code does)."""
    assert k >= 1, "RBM.forward requires k >= 1"
    B, n_vis = v.shape
    n_hid = W.shape[0]
    tb = _pick_batch_tile(B)
    grid = (B // tb,)

    # Host-side uniforms replacing torch.rand / hardware PRNG: one (B, n_hid) draw per
    # vis_hid call (k+1 of them) and one (B, n_vis) draw per hid_vis call (k of them).
    kh, kv = jax.random.split(key)
    u_h = jax.random.uniform(kh, (k + 1, B, n_hid), dtype=jnp.float32)
    u_v = jax.random.uniform(kv, (k, B, n_vis), dtype=jnp.float32)

    w_bf = W.astype(jnp.bfloat16)
    wt_bf = W.T.astype(jnp.bfloat16)
    vb2 = v_bias.reshape(1, n_vis).astype(jnp.float32)
    hb2 = h_bias.reshape(1, n_hid).astype(jnp.float32)

    v_ = pl.pallas_call(
        functools.partial(rbm_kernel, k=k),
        out_shape=jax.ShapeDtypeStruct((B, n_vis), jnp.float32),
        grid=grid,
        in_specs=[
            pl.BlockSpec((tb, n_vis), lambda i: (i, 0)),          # v tile
            pl.BlockSpec((n_vis, n_hid), lambda i: (0, 0)),       # W.T (resident)
            pl.BlockSpec((n_hid, n_vis), lambda i: (0, 0)),       # W   (resident)
            pl.BlockSpec((1, n_vis), lambda i: (0, 0)),           # v_bias
            pl.BlockSpec((1, n_hid), lambda i: (0, 0)),           # h_bias
            pl.BlockSpec((k + 1, tb, n_hid), lambda i: (0, i, 0)),  # uniforms (hidden)
            pl.BlockSpec((k, tb, n_vis), lambda i: (0, i, 0)),      # uniforms (visible)
        ],
        out_specs=pl.BlockSpec((tb, n_vis), lambda i: (i, 0)),
        compiler_params=pltpu.CompilerParams(
            dimension_semantics=("parallel",),
            vmem_limit_bytes=48 * 1024 * 1024,
        ),
    )(v.astype(jnp.float32), wt_bf, w_bf, vb2, hb2, u_h, u_v)
    return v, v_


if __name__ == "__main__":
    # Small shapes consistent with the module: batch=8, n_vis=256, n_hid=128, k=2
    B, n_vis, n_hid, k = 8, 256, 128, 2

    key = jax.random.PRNGKey(0)
    kw, kv, ku = jax.random.split(key, 3)

    # Deterministic parameter init mirroring __init__:
    #   W = randn(n_hid, n_vis) * 0.01 ; v_bias = zeros(n_vis) ; h_bias = zeros(n_hid)
    W = jax.random.normal(kw, (n_hid, n_vis), dtype=jnp.float32) * 0.01
    v_bias = jnp.zeros((n_vis,), dtype=jnp.float32)
    h_bias = jnp.zeros((n_hid,), dtype=jnp.float32)

    # Binarized visible input (typical RBM data)
    v = (jax.random.uniform(kv, (B, n_vis)) > 0.5).astype(jnp.float32)

    v_in, v_out = rbm_forward(v, W, v_bias, h_bias, k, key=ku)
    jax.block_until_ready(v_out)

    assert v_out.shape == (B, n_vis)
    assert v_out.dtype == jnp.float32
    # samples are binary {0, 1}
    assert bool(jnp.all((v_out == 0.0) | (v_out == 1.0)))

    print("KERNEL_OK")
</pallas_src>

<mosaic_0001>
module attributes {stable_mosaic.version = 11 : i64} {
  func.func @rbm_kernel(%arg0: i32, %arg1: memref<8x256xf32, #tpu.memory_space<vmem>>, %arg2: memref<256x128xbf16, #tpu.memory_space<vmem>>, %arg3: memref<128x256xbf16, #tpu.memory_space<vmem>>, %arg4: memref<1x256xf32, #tpu.memory_space<vmem>>, %arg5: memref<1x128xf32, #tpu.memory_space<vmem>>, %arg6: memref<3x8x128xf32, #tpu.memory_space<vmem>>, %arg7: memref<2x8x256xf32, #tpu.memory_space<vmem>>, %arg8: memref<8x256xf32, #tpu.memory_space<vmem>>) attributes {dimension_semantics = [#tpu.dimension_semantics<parallel>], iteration_bounds = array<i64: 1>, scalar_prefetch = 0 : i64, scratch_operands = 0 : i64, tpu.core_type = #tpu.core_type<tc>, window_params = [{transform_indices = @transform_0, window_bounds = array<i64: 8, 256>}, {pipeline_mode = #tpu.pipeline_mode<synchronous>, transform_indices = @transform_1, window_bounds = array<i64: 256, 128>}, {pipeline_mode = #tpu.pipeline_mode<synchronous>, transform_indices = @transform_2, window_bounds = array<i64: 128, 256>}, {pipeline_mode = #tpu.pipeline_mode<synchronous>, transform_indices = @transform_3, window_bounds = array<i64: 1, 256>}, {pipeline_mode = #tpu.pipeline_mode<synchronous>, transform_indices = @transform_4, window_bounds = array<i64: 1, 128>}, {transform_indices = @transform_5, window_bounds = array<i64: 3, 8, 128>}, {transform_indices = @transform_6, window_bounds = array<i64: 2, 8, 256>}, {transform_indices = @transform_7, window_bounds = array<i64: 8, 256>}]} {
    %c0 = arith.constant 0 : index
    %c0_0 = arith.constant 0 : index
    %0 = vector.load %arg2[%c0, %c0_0] : memref<256x128xbf16, #tpu.memory_space<vmem>>, vector<256x128xbf16>
    %c0_1 = arith.constant 0 : index
    %c0_2 = arith.constant 0 : index
    %1 = vector.load %arg3[%c0_1, %c0_2] : memref<128x256xbf16, #tpu.memory_space<vmem>>, vector<128x256xbf16>
    %c0_3 = arith.constant 0 : index
    %c0_4 = arith.constant 0 : index
    %2 = vector.load %arg5[%c0_3, %c0_4] : memref<1x128xf32, #tpu.memory_space<vmem>>, vector<1x128xf32>
    %3 = vector.shape_cast %2 : vector<1x128xf32> to vector<1x128xf32>
    %4 = vector.broadcast %3 : vector<1x128xf32> to vector<8x128xf32>
    %c0_5 = arith.constant 0 : index
    %c0_6 = arith.constant 0 : index
    %5 = vector.load %arg4[%c0_5, %c0_6] : memref<1x256xf32, #tpu.memory_space<vmem>>, vector<1x256xf32>
    %6 = vector.shape_cast %5 : vector<1x256xf32> to vector<1x256xf32>
    %7 = vector.broadcast %6 : vector<1x256xf32> to vector<8x256xf32>
    %c0_7 = arith.constant 0 : index
    %c0_8 = arith.constant 0 : index
    %8 = vector.load %arg1[%c0_7, %c0_8] : memref<8x256xf32, #tpu.memory_space<vmem>>, vector<8x256xf32>
    %9 = arith.truncf %8 : vector<8x256xf32> to vector<8x256xbf16>
    %c0_9 = arith.constant 0 : index
    %c0_10 = arith.constant 0 : index
    %c0_11 = arith.constant 0 : index
    %10 = vector.load %arg6[%c0_9, %c0_10, %c0_11] : memref<3x8x128xf32, #tpu.memory_space<vmem>>, vector<1x8x128xf32>
    %11 = vector.shape_cast %10 : vector<1x8x128xf32> to vector<8x128xf32>
    %cst = arith.constant dense<0.000000e+00> : vector<8x128xf32>
    %12 = tpu.matmul %9, %0, %cst {dimension_numbers = #tpu.dot_dimension_numbers<[1], [0], [0], [1], [0, 0, 1, 1], [], []>} : vector<8x256xbf16>, vector<256x128xbf16>, vector<8x128xf32> -> vector<8x128xf32>
    %13 = arith.addf %12, %4 : vector<8x128xf32>
    %cst_12 = arith.constant 5.000000e-01 : f32
    %14 = vector.broadcast %cst_12 : f32 to vector<8x128xf32>
    %15 = arith.mulf %14, %13 : vector<8x128xf32>
    %16 = math.tanh %15 : vector<8x128xf32>
    %cst_13 = arith.constant 1.000000e+00 : f32
    %17 = vector.broadcast %cst_13 : f32 to vector<8x128xf32>
    %18 = arith.addf %16, %17 : vector<8x128xf32>
    %cst_14 = arith.constant 5.000000e-01 : f32
    %19 = vector.broadcast %cst_14 : f32 to vector<8x128xf32>
    %20 = arith.mulf %19, %18 : vector<8x128xf32>
    %21 = arith.cmpf ogt, %20, %11 : vector<8x128xf32>
    %22 = arith.extui %21 : vector<8x128xi1> to vector<8x128xi32>
    %23 = arith.sitofp %22 : vector<8x128xi32> to vector<8x128xf32>
    %24 = arith.truncf %23 : vector<8x128xf32> to vector<8x128xbf16>
    %c0_15 = arith.constant 0 : index
    %c0_16 = arith.constant 0 : index
    %c0_17 = arith.constant 0 : index
    %25 = vector.load %arg7[%c0_15, %c0_16, %c0_17] : memref<2x8x256xf32, #tpu.memory_space<vmem>>, vector<1x8x256xf32>
    %26 = vector.shape_cast %25 : vector<1x8x256xf32> to vector<8x256xf32>
    %cst_18 = arith.constant dense<0.000000e+00> : vector<8x256xf32>
    %27 = tpu.matmul %24, %1, %cst_18 {dimension_numbers = #tpu.dot_dimension_numbers<[1], [0], [0], [1], [0, 0, 1, 1], [], []>} : vector<8x128xbf16>, vector<128x256xbf16>, vector<8x256xf32> -> vector<8x256xf32>
    %28 = arith.addf %27, %7 : vector<8x256xf32>
    %cst_19 = arith.constant 5.000000e-01 : f32
    %29 = vector.broadcast %cst_19 : f32 to vector<8x256xf32>
    %30 = arith.mulf %29, %28 : vector<8x256xf32>
    %31 = math.tanh %30 : vector<8x256xf32>
    %cst_20 = arith.constant 1.000000e+00 : f32
    %32 = vector.broadcast %cst_20 : f32 to vector<8x256xf32>
    %33 = arith.addf %31, %32 : vector<8x256xf32>
    %cst_21 = arith.constant 5.000000e-01 : f32
    %34 = vector.broadcast %cst_21 : f32 to vector<8x256xf32>
    %35 = arith.mulf %34, %33 : vector<8x256xf32>
    %36 = arith.cmpf ogt, %35, %26 : vector<8x256xf32>
    %37 = arith.extui %36 : vector<8x256xi1> to vector<8x256xi32>
    %38 = arith.sitofp %37 : vector<8x256xi32> to vector<8x256xf32>
    %39 = arith.truncf %38 : vector<8x256xf32> to vector<8x256xbf16>
    %c1 = arith.constant 1 : index
    %c0_22 = arith.constant 0 : index
    %c0_23 = arith.constant 0 : index
    %40 = vector.load %arg6[%c1, %c0_22, %c0_23] : memref<3x8x128xf32, #tpu.memory_space<vmem>>, vector<1x8x128xf32>
    %41 = vector.shape_cast %40 : vector<1x8x128xf32> to vector<8x128xf32>
    %cst_24 = arith.constant dense<0.000000e+00> : vector<8x128xf32>
    %42 = tpu.matmul %39, %0, %cst_24 {dimension_numbers = #tpu.dot_dimension_numbers<[1], [0], [0], [1], [0, 0, 1, 1], [], []>} : vector<8x256xbf16>, vector<256x128xbf16>, vector<8x128xf32> -> vector<8x128xf32>
    %43 = arith.addf %42, %4 : vector<8x128xf32>
    %cst_25 = arith.constant 5.000000e-01 : f32
    %44 = vector.broadcast %cst_25 : f32 to vector<8x128xf32>
    %45 = arith.mulf %44, %43 : vector<8x128xf32>
    %46 = math.tanh %45 : vector<8x128xf32>
    %cst_26 = arith.constant 1.000000e+00 : f32
    %47 = vector.broadcast %cst_26 : f32 to vector<8x128xf32>
    %48 = arith.addf %46, %47 : vector<8x128xf32>
    %cst_27 = arith.constant 5.000000e-01 : f32
    %49 = vector.broadcast %cst_27 : f32 to vector<8x128xf32>
    %50 = arith.mulf %49, %48 : vector<8x128xf32>
    %51 = arith.cmpf ogt, %50, %41 : vector<8x128xf32>
    %52 = arith.extui %51 : vector<8x128xi1> to vector<8x128xi32>
    %53 = arith.sitofp %52 : vector<8x128xi32> to vector<8x128xf32>
    %54 = arith.truncf %53 : vector<8x128xf32> to vector<8x128xbf16>
    %c1_28 = arith.constant 1 : index
    %c0_29 = arith.constant 0 : index
    %c0_30 = arith.constant 0 : index
    %55 = vector.load %arg7[%c1_28, %c0_29, %c0_30] : memref<2x8x256xf32, #tpu.memory_space<vmem>>, vector<1x8x256xf32>
    %56 = vector.shape_cast %55 : vector<1x8x256xf32> to vector<8x256xf32>
    %cst_31 = arith.constant dense<0.000000e+00> : vector<8x256xf32>
    %57 = tpu.matmul %54, %1, %cst_31 {dimension_numbers = #tpu.dot_dimension_numbers<[1], [0], [0], [1], [0, 0, 1, 1], [], []>} : vector<8x128xbf16>, vector<128x256xbf16>, vector<8x256xf32> -> vector<8x256xf32>
    %58 = arith.addf %57, %7 : vector<8x256xf32>
    %cst_32 = arith.constant 5.000000e-01 : f32
    %59 = vector.broadcast %cst_32 : f32 to vector<8x256xf32>
    %60 = arith.mulf %59, %58 : vector<8x256xf32>
    %61 = math.tanh %60 : vector<8x256xf32>
    %cst_33 = arith.constant 1.000000e+00 : f32
    %62 = vector.broadcast %cst_33 : f32 to vector<8x256xf32>
    %63 = arith.addf %61, %62 : vector<8x256xf32>
    %cst_34 = arith.constant 5.000000e-01 : f32
    %64 = vector.broadcast %cst_34 : f32 to vector<8x256xf32>
    %65 = arith.mulf %64, %63 : vector<8x256xf32>
    %66 = arith.cmpf ogt, %65, %56 : vector<8x256xf32>
    %67 = arith.extui %66 : vector<8x256xi1> to vector<8x256xi32>
    %68 = arith.sitofp %67 : vector<8x256xi32> to vector<8x256xf32>
    %69 = arith.truncf %68 : vector<8x256xf32> to vector<8x256xbf16>
    %70 = arith.extf %69 : vector<8x256xbf16> to vector<8x256xf32>
    %c0_35 = arith.constant 0 : index
    %c0_36 = arith.constant 0 : index
    %71 = vector.load %arg8[%c0_35, %c0_36] : memref<8x256xf32, #tpu.memory_space<vmem>>, vector<8x256xf32>
    tpu.vector_store %arg8[%c0_35, %c0_36], %70 {strides = array<i32>} : memref<8x256xf32, #tpu.memory_space<vmem>>, vector<8x256xf32>,
    return
  }
  func.func @transform_0(%arg0: i32) -> (i32, i32) {
    %c0_i32 = arith.constant 0 : i32
    %c0_i32_0 = arith.constant 0 : i32
    return %arg0, %c0_i32 : i32, i32
  }
  func.func @transform_1(%arg0: i32) -> (i32, i32) {
    %c0_i32 = arith.constant 0 : i32
    %c0_i32_0 = arith.constant 0 : i32
    %c0_i32_1 = arith.constant 0 : i32
    return %c0_i32, %c0_i32_0 : i32, i32
  }
  func.func @transform_2(%arg0: i32) -> (i32, i32) {
    %c0_i32 = arith.constant 0 : i32
    %c0_i32_0 = arith.constant 0 : i32
    %c0_i32_1 = arith.constant 0 : i32
    return %c0_i32, %c0_i32_0 : i32, i32
  }
  func.func @transform_3(%arg0: i32) -> (i32, i32) {
    %c0_i32 = arith.constant 0 : i32
    %c0_i32_0 = arith.constant 0 : i32
    %c0_i32_1 = arith.constant 0 : i32
    return %c0_i32, %c0_i32_0 : i32, i32
  }
  func.func @transform_4(%arg0: i32) -> (i32, i32) {
    %c0_i32 = arith.constant 0 : i32
    %c0_i32_0 = arith.constant 0 : i32
    %c0_i32_1 = arith.constant 0 : i32
    return %c0_i32, %c0_i32_0 : i32, i32
  }
  func.func @transform_5(%arg0: i32) -> (i32, i32, i32) {
    %c0_i32 = arith.constant 0 : i32
    %c0_i32_0 = arith.constant 0 : i32
    %c0_i32_1 = arith.constant 0 : i32
    return %c0_i32, %arg0, %c0_i32_0 : i32, i32, i32
  }
  func.func @transform_6(%arg0: i32) -> (i32, i32, i32) {
    %c0_i32 = arith.constant 0 : i32
    %c0_i32_0 = arith.constant 0 : i32
    %c0_i32_1 = arith.constant 0 : i32
    return %c0_i32, %arg0, %c0_i32_0 : i32, i32, i32
  }
  func.func @transform_7(%arg0: i32) -> (i32, i32) {
    %c0_i32 = arith.constant 0 : i32
    %c0_i32_0 = arith.constant 0 : i32
    return %arg0, %c0_i32 : i32, i32
  }
}

</mosaic_0001>

<bundles_post_ra>
// kernel: tpu_custom_call.1
= control target key start
LH: loop header
LB: loop body
LE: loop exit
PB: predicated region body
PF: predicated region fallthrough
CT: control target
= control target key end

     0   :  { %12 = vsyncpa [#allocation3], 0  ;;  %s961_s0 = inlined_call_operand.hbm [shape: f32[8,256], index: 0, kind: input, shape index: {}]   ;;  %s962_s1 = inlined_call_operand.hbm [shape: bf16[256,128], index: 1, kind: input, shape index: {}]   ;;  %s963_s2 = inlined_call_operand.hbm [shape: bf16[128,256], index: 2, kind: input, shape index: {}]   ;;  %s964_s3 = inlined_call_operand.vmem [shape: f32[1,256], index: 3, kind: input, shape index: {}]   ;;  %s965_s4 = inlined_call_operand.vmem [shape: f32[1,128], index: 4, kind: input, shape index: {}]   ;;  %s966_s5 = inlined_call_operand.hbm [shape: f32[3,8,128], index: 5, kind: input, shape index: {}]   ;;  %s967_s6 = inlined_call_operand.hbm [shape: f32[2,8,256], index: 6, kind: input, shape index: {}]   ;;  %s968_s7 = inlined_call_operand.hbm [shape: f32[8,256], index: 7, kind: output, shape index: {}]  }
   0x1   :  { %13 = vsyncpa [#allocation6], 0 }
   0x2   :  { %14 = vsyncpa [#allocation9], 0 }
   0x3   :  { %15 = vsyncpa [#allocation4], 0  ;;  %s866_s24 = smov [#allocation5]  }
   0x4   :  { %s31_s25 = sshll.u32 %s866_s24, 4  ;;  %s32_s25 = int_to_ptr.vmem [resolvable:$true] %s31_s25 }
   0x5   :  { %s746_s26 = scalar_lea.vmem %s32_s25, 2048  ;;  %p751_p1 = scmp.lt.s32.totalorder %s32_s25, %s32_s25 }
   0x6   :  { %p747_p0 = scmp.ne.s32.totalorder %s32_s25, %s746_s26  ;;  %p752_p2 = scmp.lt.s32.totalorder %s746_s26, %s746_s26 }
   0x8   :  { %p753_p3 = por %p752_p2, %p751_p1 }
   0xa   :  { %p754_p4 = pnand %p753_p3, %p747_p0 }
   0xc   :  { %757 = shalt.err (!%p754_p4)
}
   0xd   :  { %s867_s27 = smov 64   ;;  %s868_s28 = smov 4  }
   0xe   :  { %37 = dma.hbm_to_vmem [thread:$0]  %s962_s1, 2048, %s32_s25, [#allocation6], %s867_s27, %s867_s27, %s868_s28  }
   0xf   :  { %s869_s8 = smov [#allocation8]   ;;  %s870_s10 = smov [#allocation2]  }
  0x10   :  { %s59_s9 = sshll.u32 %s869_s8, 4  ;;  %s22_s11 = sshll.u32 %s870_s10, 4  ;;  %s60_s9 = int_to_ptr.vmem [resolvable:$true] %s59_s9  ;;  %s23_s11 = int_to_ptr.vmem [resolvable:$true] %s22_s11 }
  0x11   :  { %s766_s12 = scalar_lea.vmem %s60_s9, 384  ;;  %p771_p6 = scmp.lt.s32.totalorder %s60_s9, %s60_s9 }
  0x12   :  { %p767_p5 = scmp.ne.s32.totalorder %s60_s9, %s766_s12  ;;  %p772_p7 = scmp.lt.s32.totalorder %s766_s12, %s766_s12 }
  0x14   :  { %p773_p8 = por %p772_p7, %p771_p6 }
  0x16   :  { %p774_p9 = pnand %p773_p8, %p767_p5 }
  0x18   :  { %777 = shalt.err (!%p774_p9)
}
  0x19   :  { %s871_s13 = smov 128   ;;  %s872_s14 = smov 8  }
  0x1a   :  { %65 = dma.hbm_to_vmem [thread:$0]  %s966_s5, 384, %s60_s9, [#allocation9], %s871_s13, %s871_s13, %s872_s14  }
  0x1b   :  { %s786_s1 = scalar_lea.vmem %s23_s11, 256  ;;  %p791_p11 = scmp.lt.s32.totalorder %s23_s11, %s23_s11 }
  0x1c   :  { %p787_p10 = scmp.ne.s32.totalorder %s23_s11, %s786_s1  ;;  %p792_p12 = scmp.lt.s32.totalorder %s786_s1, %s786_s1 }
  0x1e   :  { %p793_p13 = por %p792_p12, %p791_p11 }
  0x20   :  { %p794_p0 = pnand %p793_p13, %p787_p10 }
  0x22   :  { %797 = shalt.err (!%p794_p0)
}
  0x23   :  { %25 = dma.hbm_to_vmem [thread:$0]  %s961_s0, 256, %s23_s11, [#allocation3]  }
  0x24   :  { %s873_s19 = smov [#allocation7]   ;;  %s874_s21 = smov [#allocation10]  }
  0x25   :  { %s43_s20 = sshll.u32 %s873_s19, 4  ;;  %s71_s22 = sshll.u32 %s874_s21, 4  ;;  %s44_s20 = int_to_ptr.vmem [resolvable:$true] %s43_s20  ;;  %s72_s22 = int_to_ptr.vmem [resolvable:$true] %s71_s22 }
  0x26   :  { %s806_s23 = scalar_lea.vmem %s44_s20, 2048  ;;  %p811_p2 = scmp.lt.s32.totalorder %s44_s20, %s44_s20 }
  0x27   :  { %p807_p1 = scmp.ne.s32.totalorder %s44_s20, %s806_s23  ;;  %p812_p3 = scmp.lt.s32.totalorder %s806_s23, %s806_s23 }
  0x29   :  { %p813_p4 = por %p812_p3, %p811_p2 }
  0x2b   :  { %p814_p5 = pnand %p813_p4, %p807_p1 }
  0x2d   :  { %817 = shalt.err (!%p814_p5)
}
  0x2e   :  { %49 = dma.hbm_to_vmem [thread:$0]  %s963_s2, 2048, %s44_s20, [#allocation6], %s871_s13, %s871_s13, %s872_s14  }
  0x2f   :  { %s826_s25 = scalar_lea.vmem %s72_s22, 512  ;;  %p831_p7 = scmp.lt.s32.totalorder %s72_s22, %s72_s22 }
  0x30   :  { %p827_p6 = scmp.ne.s32.totalorder %s72_s22, %s826_s25  ;;  %p832_p8 = scmp.lt.s32.totalorder %s826_s25, %s826_s25 }
  0x32   :  { %p833_p9 = por %p832_p8, %p831_p7 }
  0x34   :  { %p834_p10 = pnand %p833_p9, %p827_p6 }
  0x36   :  { %837 = shalt.err (!%p834_p10)
}
  0x37   :  { %s875_s0 = smov 256   ;;  %s876_s26 = smov 16  }
  0x38   :  { %77 = dma.hbm_to_vmem [thread:$0]  %s967_s6, 512, %s72_s22, [#allocation9], %s875_s0, %s875_s0, %s876_s26  }
  0x39   :  { %858 = dma.done.wait [#allocation3], 256  }
  0x3a   :  { %859 = vsyncadd [#allocation3], 4294967040 }
  0x3b   :  { %860 = dma.done.wait [#allocation6], 4096  }
  0x3c   :  { %861 = vsyncadd [#allocation6], 4294963200 }
  0x3d   :  { %862 = dma.done.wait [#allocation9], 896  }
  0x3e   :  { %863 = vsyncadd [#allocation9], 4294966400  ;;  %v686_v0 = vld [vmem:[#allocation5 + $0x78] sm:$0xff]   ;;  %v688_v2 = vld [vmem:[#allocation5 + $0x70] sm:$0xff]   ;;  %v877_v31 = vmov 0   ;;  %v151_v50 = vlaneseq }
  0x3f   :  { %v687_v1 = vld [vmem:[#allocation5 + $0x38] sm:$0xff]   ;;  %627 = vmatprep.subr.bf16.mxu0 %v686_v0  ;;  %v689_v3 = vld [vmem:[#allocation5 + $0x30] sm:$0xff]   ;;  %v690_v4 = vld [vmem:[#allocation5 + $0x68] sm:$0xff]   ;;  %424 = vmatprep.mubr.bf16.mxu1 %v877_v31  ;;  %v878_v49 = vmov 1.0|1.0  }
  0x40   :  { %628 = vmatpush3.bf16.msra.mxu0 %v687_v1  ;;  %v691_v5 = vld [vmem:[#allocation5 + $0x28] sm:$0xff]   ;;  %v692_v6 = vld [vmem:[#allocation5 + $0x60] sm:$0xff]   ;;  %v694_v8 = vld [vmem:[#allocation5 + $0x58] sm:$0xff]   ;;  %v152_v51 = vshrl.u32 %v151_v50, 7 }
  0x41   :  { %629 = vmatprep.subr.bf16.mxu0 %v688_v2  ;;  %v693_v7 = vld [vmem:[#allocation5 + $0x20] sm:$0xff]   ;;  %v695_v9 = vld [vmem:[#allocation5 + $0x18] sm:$0xff]   ;;  %v696_v10 = vld [vmem:[#allocation5 + $0x50] sm:$0xff]  }
  0x42   :  { %v162_v11 = vld [vmem:[#allocation2 + $0x8] sm:$0xff]  ;;  %v697_v12 = vld [vmem:[#allocation5 + $0x10] sm:$0xff]   ;;  %v698_v16 = vld [vmem:[#allocation5 + $0x48] sm:$0xff]   ;;  %v153_v52 = vsub.s32 0, %v152_v51  ;;  %v157_v54 = vsub.s32 1, %v152_v51 }
  0x43   :  { %v164_v13 = vpack.c.bf16 %v162_v11, %v162_v11  ;;  %v936_v14 = vld [vmem:[#allocation7 + $0x74] ss:$8 sps:$4 sm:$0xff]   ;;  %v938_v15 = vld [vmem:[#allocation7 + $0x70] ss:$8 sps:$4 sm:$0xff]   ;;  %v699_v17 = vld [vmem:[#allocation5 + $0x8] sm:$0xff]  }
  0x44   :  { %630 = vmatpush3.bf16.msra.mxu0 %v689_v3  ;;  %392 = vmatprep.subr.bf16.mxu1 %v936_v14  ;;  %v700_v18 = vld [vmem:[#allocation5 + $0x40] sm:$0xff]   ;;  %v161_v20 = vld [vmem:[#allocation2] sm:$0xff] }
  0x45   :  { %631 = vmatprep.subr.bf16.mxu0 %v690_v4  ;;  %294 = vmatprep.mubr.bf16.mxu0 %v164_v13  ;;  %v701_v19 = vld [vmem:[#allocation5] sm:$0xff]   ;;  %v163_v21 = vpack.c.bf16 %v161_v20, %v161_v20  ;;  %v708_v24 = vld [vmem:[#allocation7 + $0x54] ss:$8 sps:$4 sm:$0xff]   ;;  %v710_v25 = vld [vmem:[#allocation7 + $0x50] ss:$8 sps:$4 sm:$0xff]  }
  0x46   :  { %393 = vmatpush1.bf16.msra.mxu1 %v938_v15  ;;  %v705_v22 = vld [vmem:[#allocation7 + $0x64] ss:$8 sps:$4 sm:$0xff]   ;;  %v707_v23 = vld [vmem:[#allocation7 + $0x60] ss:$8 sps:$4 sm:$0xff]   ;;  %v714_v28 = vld [vmem:[#allocation7 + $0x34] ss:$8 sps:$4 sm:$0xff]  }
  0x47   :  { %394 = vmatprep.subr.bf16.mxu1 %v705_v22  ;;  %v711_v26 = vld [vmem:[#allocation7 + $0x44] ss:$8 sps:$4 sm:$0xff]   ;;  %v713_v27 = vld [vmem:[#allocation7 + $0x40] ss:$8 sps:$4 sm:$0xff]   ;;  %v716_v29 = vld [vmem:[#allocation7 + $0x30] ss:$8 sps:$4 sm:$0xff]  }
  0x48   :  { %632 = vmatpush3.bf16.msra.mxu0 %v691_v5  ;;  %v717_v30 = vld [vmem:[#allocation7 + $0x24] ss:$8 sps:$4 sm:$0xff]   ;;  %v719_v32 = vld [vmem:[#allocation7 + $0x20] ss:$8 sps:$4 sm:$0xff]   ;;  %v720_v33 = vld [vmem:[#allocation7 + $0x14] ss:$8 sps:$4 sm:$0xff]  }
  0x49   :  { %633 = vmatprep.subr.bf16.mxu0 %v692_v6  ;;  %v722_v34 = vld [vmem:[#allocation7 + $0x10] ss:$8 sps:$4 sm:$0xff]   ;;  %v723_v35 = vld [vmem:[#allocation7 + $0x4] ss:$8 sps:$4 sm:$0xff]   ;;  %v725_v36 = vld [vmem:[#allocation7] ss:$8 sps:$4 sm:$0xff]  }
  0x4a   :  { %395 = vmatpush1.bf16.msra.mxu1 %v707_v23  ;;  %v946_v38 = vld [vmem:[%s965_s4] ss:$0 sm:$0xff]  ;;  %v165_v47 = vld [vmem:[#allocation8] sm:$0xff] }
  0x4b   :  { %396 = vmatprep.subr.bf16.mxu1 %v708_v24  ;;  %v149_v53 = vld [vmem:[%s964_s3] sm:$0x3]  ;;  %s879_s3 = smov [#allocation11]  }
  0x4c   :  { %634 = vmatpush3.bf16.msra.mxu0 %v693_v7  ;;  %v154_v55 = vrot.slane %v149_v53, %v153_v52  ;;  %v158_v56 = vrot.slane %v149_v53, %v157_v54  ;;  %s569_s30 = sshll.u32 %s879_s3, 4  ;;  %s570_s30 = int_to_ptr.vmem [resolvable:$true] %s569_s30 }
  0x4d   :  { %635 = vmatprep.subr.bf16.mxu0 %v694_v8  ;;  %s838_s8 = scalar_lea.vmem %s570_s30, 256  ;;  %p843_p12 = scmp.lt.s32.totalorder %s570_s30, %s570_s30 }
  0x4e   :  { %397 = vmatpush1.bf16.msra.mxu1 %v710_v25  ;;  %p839_p11 = scmp.ne.s32.totalorder %s570_s30, %s838_s8  ;;  %p844_p13 = scmp.lt.s32.totalorder %s838_s8, %s838_s8 }
  0x4f   :  { %398 = vmatprep.subr.bf16.mxu1 %v711_v26 }
  0x50   :  { %636 = vmatpush3.bf16.msra.mxu0 %v695_v9  ;;  %p845_p0 = por %p844_p13, %p843_p12 }
  0x51   :  { %637 = vmatprep.subr.bf16.mxu0 %v696_v10 }
  0x52   :  { %399 = vmatpush1.bf16.msra.mxu1 %v713_v27  ;;  %p846_p1 = pnand %p845_p0, %p839_p11 }
  0x53   :  { %400 = vmatprep.subr.bf16.mxu1 %v714_v28 }
  0x54   :  { %638 = vmatpush3.bf16.msra.mxu0 %v697_v12 }
  0x55   :  { %639 = vmatprep.subr.bf16.mxu0 %v698_v16 }
  0x56   :  { %401 = vmatpush1.bf16.msra.mxu1 %v716_v29 }
  0x57   :  { %402 = vmatprep.subr.bf16.mxu1 %v717_v30 }
  0x58   :  { %640 = vmatpush3.bf16.msra.mxu0 %v699_v17 }
  0x59   :  { %641 = vmatprep.subr.bf16.mxu0 %v700_v18 }
  0x5a   :  { %403 = vmatpush1.bf16.msra.mxu1 %v719_v32 }
  0x5b   :  { %404 = vmatprep.subr.bf16.mxu1 %v720_v33 }
  0x5c   :  { %642 = vmatpush3.bf16.msra.mxu0 %v701_v19 }
  0x5d   :  { %649 = vmatprep.subr.bf16.mxu0 %v686_v0 }
  0x5e   :  { %405 = vmatpush1.bf16.msra.mxu1 %v722_v34 }
  0x5f   :  { %295 = vmatmul.mubr.bf16.vlgmr.msra.gmra.mxu0 %v163_v21  ;;  %406 = vmatprep.subr.bf16.mxu1 %v723_v35 }
  0x60   :  { %650 = vmatpush3.bf16.msra.mxu0 %v687_v1 }
  0x61   :  { %651 = vmatprep.subr.bf16.mxu0 %v688_v2 }
  0x62   :  { %407 = vmatpush1.bf16.msra.mxu1 %v725_v36 }
  0x63   :  { %502 = vmatprep.subr.bf16.mxu1 %v936_v14 }
  0x64   :  { %652 = vmatpush3.bf16.msra.mxu0 %v689_v3 }
  0x65   :  { %653 = vmatprep.subr.bf16.mxu0 %v690_v4 }
  0x68   :  { %654 = vmatpush3.bf16.msra.mxu0 %v691_v5 }
  0x69   :  { %655 = vmatprep.subr.bf16.mxu0 %v692_v6  ;;  %v310_v6 = vld [vmem:[#allocation10] sm:$0xff] }
  0x6c   :  { %656 = vmatpush3.bf16.msra.mxu0 %v693_v7  ;;  %v311_v7 = vld [vmem:[#allocation10 + $0x8] sm:$0xff] }
  0x6d   :  { %657 = vmatprep.subr.bf16.mxu0 %v694_v8 }
  0x70   :  { %658 = vmatpush3.bf16.msra.mxu0 %v695_v9 }
  0x71   :  { %659 = vmatprep.subr.bf16.mxu0 %v696_v10 }
  0x74   :  { %660 = vmatpush3.bf16.msra.mxu0 %v697_v12 }
  0x75   :  { %661 = vmatprep.subr.bf16.mxu0 %v698_v16 }
  0x78   :  { %662 = vmatpush3.bf16.msra.mxu0 %v699_v17 }
  0x79   :  { %663 = vmatprep.subr.bf16.mxu0 %v700_v18  ;;  %v450_v18 = vld [vmem:[#allocation8 + $0x8] sm:$0xff] }
  0x7c   :  { %664 = vmatpush3.bf16.msra.mxu0 %v701_v19 }
 0x11f   :  { %v643_v37 = vpop.f32.mrf.mxu0 }
 0x121   :  { %v644_v39 = vpop.f32.mrf.mxu0 }
 0x122   :  { %v645_v40 = vadd.f32 %v644_v39, %v643_v37 }
 0x123   :  { %v646_v41 = vpop.f32.mrf.mxu0 }
 0x124   :  { %v297_v42 = vadd.f32 %v645_v40, %v946_v38 }
 0x125   :  { %v647_v43 = vpop.f32.mrf.mxu0 }
 0x126   :  { %v302_v44 = vmul.f32 0.5, %v297_v42 }
 0x128   :  { %726 = vtanh.f32 %v302_v44 }
 0x135   :  { %v727_v45 = vpop.eup %726 }
 0x136   :  { %v304_v46 = vadd.f32 1.0, %v727_v45 }
 0x138   :  { %v305_v48 = vmul.f32 0.5, %v304_v46 }
 0x13a   :  { %vm306_vm0 = vcmp.gt.f32.partialorder %v305_v48, %v165_v47 }
 0x13b   :  { %vm614_vm1 = vmpackc.low %vm306_vm0, %vm306_vm0 }
 0x13c   :  { %615 = vmatmul.mubr.msk.bf16.vlgmr.msra.gmra.mxu1 %vm614_vm1, %v878_v49 }
 0x13d   :  { %503 = vmatpush1.bf16.msra.mxu1 %v938_v15  ;;  %534 = vmatprep.mubr.bf16.mxu1 %v877_v31  ;;  %v500_v31 = vld [vmem:[#allocation10 + $0x10] sm:$0xff] }
 0x13e   :  { %504 = vmatprep.subr.bf16.mxu1 %v705_v22 }
 0x141   :  { %505 = vmatpush1.bf16.msra.mxu1 %v707_v23 }
 0x142   :  { %506 = vmatprep.subr.bf16.mxu1 %v708_v24 }
 0x145   :  { %507 = vmatpush1.bf16.msra.mxu1 %v710_v25 }
 0x146   :  { %508 = vmatprep.subr.bf16.mxu1 %v711_v26 }
 0x149   :  { %509 = vmatpush1.bf16.msra.mxu1 %v713_v27 }
 0x14a   :  { %510 = vmatprep.subr.bf16.mxu1 %v714_v28 }
 0x14d   :  { %511 = vmatpush1.bf16.msra.mxu1 %v716_v29 }
 0x14e   :  { %512 = vmatprep.subr.bf16.mxu1 %v717_v30 }
 0x151   :  { %513 = vmatpush1.bf16.msra.mxu1 %v719_v32 }
 0x152   :  { %514 = vmatprep.subr.bf16.mxu1 %v720_v33 }
 0x155   :  { %515 = vmatpush1.bf16.msra.mxu1 %v722_v34  ;;  %v501_v34 = vld [vmem:[#allocation10 + $0x18] sm:$0xff] }
 0x156   :  { %516 = vmatprep.subr.bf16.mxu1 %v723_v35 }
 0x159   :  { %517 = vmatpush1.bf16.msra.mxu1 %v725_v36  ;;  %v880_v36 = vmov 0.0  }
 0x1fc   :  { %v426_v57 = vpop.f32.mrf.mxu1 }
 0x1fd   :  { %v427_v58 = vadd.f32 %v426_v57, %v154_v55 }
 0x1fe   :  { %v428_v59 = vpop.f32.mrf.mxu1 }
 0x1ff   :  { %v433_v60 = vmul.f32 0.5, %v427_v58  ;;  %v429_v61 = vadd.f32 %v428_v59, %v158_v56 }
 0x200   :  { %v430_v62 = vpop.f32.mrf.mxu1 }
 0x201   :  { %728 = vtanh.f32 %v433_v60  ;;  %v434_v63 = vmul.f32 0.5, %v429_v61 }
 0x202   :  { %v431_v0 = vpop.f32.mrf.mxu1 }
 0x203   :  { %730 = vtanh.f32 %v434_v63 }
 0x20e   :  { %v729_v1 = vpop.eup %728 }
 0x20f   :  { %v437_v2 = vadd.f32 1.0, %v729_v1 }
 0x210   :  { %v731_v3 = vpop.eup %730 }
 0x211   :  { %v439_v4 = vmul.f32 0.5, %v437_v2  ;;  %v438_v5 = vadd.f32 1.0, %v731_v3 }
 0x213   :  { %v440_v8 = vmul.f32 0.5, %v438_v5  ;;  %vm441_vm2 = vcmp.gt.f32.partialorder %v439_v4, %v310_v6 }
 0x214   :  { %vm620_vm5 = vmpackc.low %vm441_vm2, %vm441_vm2 }
 0x215   :  { %vm442_vm3 = vcmp.gt.f32.partialorder %v440_v8, %v311_v7 }
 0x216   :  { %vm618_vm4 = vmpackc.low %vm442_vm3, %vm442_vm3 }
 0x217   :  { %619 = vmatprep.mubr.msk.bf16.mxu0 %vm618_vm4, %v878_v49 }
 0x218   :  { %621 = vmatmul.mubr.msk.bf16.vlgmr.msra.gmra.mxu0 %vm620_vm5, %v878_v49 }
 0x2d8   :  { %v665_v9 = vpop.f32.mrf.mxu0 }
 0x2da   :  { %v666_v10 = vpop.f32.mrf.mxu0 }
 0x2db   :  { %v667_v11 = vadd.f32 %v666_v10, %v665_v9 }
 0x2dc   :  { %v668_v12 = vpop.f32.mrf.mxu0 }
 0x2dd   :  { %v486_v13 = vadd.f32 %v667_v11, %v946_v38 }
 0x2de   :  { %v669_v14 = vpop.f32.mrf.mxu0 }
 0x2df   :  { %v491_v15 = vmul.f32 0.5, %v486_v13 }
 0x2e1   :  { %732 = vtanh.f32 %v491_v15 }
 0x2ee   :  { %v733_v16 = vpop.eup %732 }
 0x2ef   :  { %v493_v17 = vadd.f32 1.0, %v733_v16 }
 0x2f1   :  { %v494_v19 = vmul.f32 0.5, %v493_v17 }
 0x2f3   :  { %vm495_vm6 = vcmp.gt.f32.partialorder %v494_v19, %v450_v18 }
 0x2f4   :  { %vm623_vm7 = vmpackc.low %vm495_vm6, %vm495_vm6 }
 0x2f5   :  { %624 = vmatmul.mubr.msk.bf16.vlgmr.msra.gmra.mxu1 %vm623_vm7, %v878_v49 }
 0x3b5   :  { %v536_v20 = vpop.f32.mrf.mxu1 }
 0x3b6   :  { %v537_v21 = vadd.f32 %v536_v20, %v154_v55 }
 0x3b7   :  { %v538_v22 = vpop.f32.mrf.mxu1 }
 0x3b8   :  { %v543_v23 = vmul.f32 0.5, %v537_v21  ;;  %v539_v24 = vadd.f32 %v538_v22, %v158_v56 }
 0x3b9   :  { %v540_v25 = vpop.f32.mrf.mxu1 }
 0x3ba   :  { %734 = vtanh.f32 %v543_v23  ;;  %v544_v26 = vmul.f32 0.5, %v539_v24 }
 0x3bb   :  { %v541_v27 = vpop.f32.mrf.mxu1 }
 0x3bc   :  { %736 = vtanh.f32 %v544_v26 }
 0x3c7   :  { %v735_v28 = vpop.eup %734 }
 0x3c8   :  { %v547_v29 = vadd.f32 1.0, %v735_v28 }
 0x3c9   :  { %v737_v30 = vpop.eup %736 }
 0x3ca   :  { %v549_v32 = vmul.f32 0.5, %v547_v29  ;;  %v548_v33 = vadd.f32 1.0, %v737_v30 }
 0x3cc   :  { %v550_v35 = vmul.f32 0.5, %v548_v33  ;;  %vm551_vm8 = vcmp.gt.f32.partialorder %v549_v32, %v500_v31 }
 0x3cd   :  { %v625_v37 = vsel %vm551_vm8, 1.0, %v880_v36 }
 0x3ce   :  { %vm552_vm9 = vcmp.gt.f32.partialorder %v550_v35, %v501_v34  ;;  %561 = vst [vmem:[#allocation11] sm:$0xff] %v625_v37 }
 0x3cf   :  { %v626_v38 = vsel %vm552_vm9, 1.0, %v880_v36 }
 0x3d0   :  { %562 = vst [vmem:[#allocation11 + $0x8] sm:$0xff] %v626_v38 }
 0x3d1   :  { %849 = shalt.err (!%p846_p1)
}
 0x3d2   :  { %572 = dma.vmem_to_hbm [thread:$0]  %s570_s30, 256, %s968_s7, [#allocation4]  }
 0x3d3   :  { %864 = dma.done.wait [#allocation4], 256  }
 0x3d4   :  { %865 = vsyncadd [#allocation4], 4294967040 }
 0x3d5   :  { %576 = vsyncpa [#allocation3], 1 }
 0x3d6   :  { %577 = vsyncpa [#allocation6], 1 }
 0x3d7   :  { %578 = vsyncpa [#allocation9], 1 }
 0x3d8   :  { %579 = vsyncpa [#allocation4], 1 }

</bundles_post_ra>
